<compile_context>
chip_gen: v6e
topology: v6e:2x2x1
jax: 0.10.0
libtpu: 0.0.40
codegen_flags: <defaults>
</compile_context>

<pallas_src>
import functools

import jax
import jax.numpy as jnp
from jax.experimental import pallas as pl
from jax.experimental.pallas import tpu as pltpu

_LANE = 128
_OFFSETS = tuple((oy, ox) for oy in (-1, 0, 1) for ox in (-1, 0, 1))


def _round_up(x, m):
    return (x + m - 1) // m * m


def _col_stats(y):
    """Per-channel (sum, sum-of-squares) of an (Rt, C) f32 tile -> (2, C)."""
    s = jnp.sum(y, axis=0, keepdims=True)
    ss = jnp.sum(y * y, axis=0, keepdims=True)
    return jnp.concatenate([s, ss], axis=0)


# ---------------------------------------------------------------------------
# Stage kernels.  Each is row-tiled; the grid axis is fully parallel because
# BN statistics are emitted as per-tile partials and reduced in the wrapper.
# ---------------------------------------------------------------------------
def _conv1_kernel(x_ref, w1_ref, y1_ref, st_ref):
    # 1x1 conv: (Rt, Cp) @ (Cp, Cmp) on the MXU, f32 accumulate.
    y = jnp.dot(x_ref[...], w1_ref[...], preferred_element_type=jnp.float32)
    y1_ref[...] = y.astype(y1_ref.dtype)
    st_ref[0] = _col_stats(y)


def _conv2_kernel(y1_ref, sc1_ref, sh1_ref, w2_ref, y2_ref, st_ref, *, H, W, Cmid):
    Rt = y1_ref.shape[0]
    Kc = w2_ref.shape[0]                       # round_up(9*Cmid, 128)

    # BN1 (pre-folded scale/shift) + ReLU, in f32.
    z = jnp.maximum(
        y1_ref[...].astype(jnp.float32) * sc1_ref[...] + sh1_ref[...], 0.0)
    if Kc > z.shape[1]:                        # widen to the compact-slab width
        z = jnp.concatenate(
            [z, jnp.zeros((Rt, Kc - z.shape[1]), jnp.float32)], axis=1)

    # Spatial position of every row inside its image.  Tiles hold whole images,
    # so this is all the geometry the zero-padding mask needs.
    r = jax.lax.broadcasted_iota(jnp.int32, (Rt, 1), 0)
    hw = r % (H * W)
    hh = hw // W
    ww = hw % W

    # Compact im2col slab: tap (oy, ox) = rows shifted by oy*W + ox (row roll
    # on the XLU; wrap-around rows are always border rows and thus masked),
    # zeroed outside the image, then lane-rolled into its own Cmid-wide lane
    # block.  Real contraction K = 9*Cmid, not 9*round_up(Cmid, 128).
    slab = None
    for k, (oy, ox) in enumerate(_OFFSETS):
        d = oy * W + ox
        t = z if d == 0 else pltpu.roll(z, shift=(-d) % Rt, axis=0)
        if d != 0:
            ok = ((hh + oy >= 0) & (hh + oy < H) &
                  (ww + ox >= 0) & (ww + ox < W))
            t = jnp.where(ok, t, 0.0)
        if k:
            t = pltpu.roll(t, shift=k * Cmid, axis=1)
        slab = t if slab is None else slab + t
    slab = slab.astype(jnp.bfloat16)           # single cast of the small slab

    y = jnp.dot(slab, w2_ref[...], preferred_element_type=jnp.float32)
    y2_ref[...] = y.astype(y2_ref.dtype)
    st_ref[0] = _col_stats(y)


def _conv3_kernel(y2_ref, sc2_ref, sh2_ref, w3_ref, y3_ref, st_ref):
    z = jnp.maximum(
        y2_ref[...].astype(jnp.float32) * sc2_ref[...] + sh2_ref[...], 0.0)
    y = jnp.dot(z.astype(jnp.bfloat16), w3_ref[...],
                preferred_element_type=jnp.float32)
    y3_ref[...] = y.astype(y3_ref.dtype)
    st_ref[0] = _col_stats(y)


def _output_kernel(y3_ref, x_ref, sc3_ref, sh3_ref, o_ref):
    y = y3_ref[...].astype(jnp.float32) * sc3_ref[...] + sh3_ref[...]
    o_ref[...] = jnp.maximum(y + x_ref[...].astype(jnp.float32), 0.0)


# ---------------------------------------------------------------------------
# Wrapper.
# ---------------------------------------------------------------------------
def _bn_fold(stats, gamma, beta, count, eps):
    """Reduce per-tile (sum, sumsq) partials -> per-channel scale/shift."""
    s = jnp.sum(stats[:, 0, :], axis=0)
    ss = jnp.sum(stats[:, 1, :], axis=0)
    mean = s / count
    var = jnp.maximum(ss / count - mean * mean, 0.0)   # guard tiny negatives
    cpad = s.shape[0]
    g = jnp.pad(gamma.reshape(-1).astype(jnp.float32), (0, cpad - gamma.size))
    b = jnp.pad(beta.reshape(-1).astype(jnp.float32), (0, cpad - beta.size))
    scale = g * jax.lax.rsqrt(var + eps)
    shift = b - mean * scale
    return scale.reshape(1, -1), shift.reshape(1, -1)


def bottleneck_forward(x_nchw, params, *, eps=1e-5, tile_imgs=None):
    """Pallas forward for BottleNeck (stride=1, identity shortcut)."""
    (w1, g1, b1, w2, g2, b2, w3, g3, b3) = params
    N, Cin, H, W = x_nchw.shape
    Cmid = w1.shape[1]
    Cout = w3.shape[1]
    assert Cout == Cin, "identity shortcut requires in_channels == out_channels*expansion"
    HW = H * W
    M = N * HW

    Cp = _round_up(Cin, _LANE)        # lane-padded in/out channels
    Cmp = _round_up(Cmid, _LANE)      # lane-padded mid channels
    Kc = _round_up(9 * Cmid, _LANE)   # compact im2col K
    f32, bf16 = jnp.float32, jnp.bfloat16

    # ---- per-generation sizing: VMEM capacity -> tile rows & scoped limit ----
    try:
        vmem_cap = int(pltpu.get_tpu_info().vmem_capacity_bytes)
    except Exception:                 # pragma: no cover - conservative fallback
        vmem_cap = 64 * 1024 * 1024   # v7x per-TensorCore VMEM
    if tile_imgs is None:
        # rough per-row live set for the widest stage (conv2): f32 temps plus
        # double-buffered bf16 activation tiles.
        per_row = 4 * (3 * Kc + 2 * Cmp + Cp) + 2 * 2 * (Cp + 2 * Cmp)
        tile_imgs = max(1, min(N, (vmem_cap // 6) // max(per_row * HW, 1)))
        while N % tile_imgs:
            tile_imgs -= 1
    assert N % tile_imgs == 0
    Rt = tile_imgs * HW
    num_tiles = N // tile_imgs
    assert Rt % 16 == 0, "tile rows must be sublane-aligned for bf16 tiles"

    cparams = pltpu.CompilerParams(
        dimension_semantics=("parallel",),
        vmem_limit_bytes=min(vmem_cap // 2, 64 * 1024 * 1024),
    )

    # ---- glue: NCHW -> (rows, lane-padded channels); bf16 activations ----
    x2d = jnp.transpose(x_nchw, (0, 2, 3, 1)).reshape(M, Cin)
    x2d = jnp.pad(x2d, ((0, 0), (0, Cp - Cin))).astype(bf16)

    def pad2(w, rr, cc):
        return jnp.pad(w, ((0, rr - w.shape[0]), (0, cc - w.shape[1]))).astype(bf16)

    w1p = pad2(w1, Cp, Cmp)                                 # (Cp, Cmp)
    w2col = pad2(w2.reshape(9 * Cmid, Cmid), Kc, Cmp)       # (Kc, Cmp) tap-major
    w3p = pad2(w3, Cmp, Cp)                                 # (Cmp, Cp)

    row_spec = lambda c: pl.BlockSpec((Rt, c), lambda i: (i, 0))
    full_spec = lambda rr, cc: pl.BlockSpec((rr, cc), lambda i: (0, 0))
    vec_spec = lambda c: pl.BlockSpec((1, c), lambda i: (0, 0))
    stat_spec = lambda c: pl.BlockSpec((1, 2, c), lambda i: (i, 0, 0))
    stat_shape = lambda c: jax.ShapeDtypeStruct((num_tiles, 2, c), f32)
    act_shape = lambda c: jax.ShapeDtypeStruct((M, c), bf16)

    # ---- stage 1: conv1 (1x1) + BN1 partial stats ----
    y1, st1 = pl.pallas_call(
        _conv1_kernel,
        grid=(num_tiles,),
        in_specs=[row_spec(Cp), full_spec(Cp, Cmp)],
        out_specs=[row_spec(Cmp), stat_spec(Cmp)],
        out_shape=[act_shape(Cmp), stat_shape(Cmp)],
        compiler_params=cparams,
    )(x2d, w1p)
    sc1, sh1 = _bn_fold(st1, g1, b1, float(M), eps)

    # ---- stage 2: BN1 + ReLU -> conv2 (3x3, compact im2col) + BN2 stats ----
    y2, st2 = pl.pallas_call(
        functools.partial(_conv2_kernel, H=H, W=W, Cmid=Cmid),
        grid=(num_tiles,),
        in_specs=[row_spec(Cmp), vec_spec(Cmp), vec_spec(Cmp), full_spec(Kc, Cmp)],
        out_specs=[row_spec(Cmp), stat_spec(Cmp)],
        out_shape=[act_shape(Cmp), stat_shape(Cmp)],
        compiler_params=cparams,
    )(y1, sc1, sh1, w2col)
    sc2, sh2 = _bn_fold(st2, g2, b2, float(M), eps)

    # ---- stage 3: BN2 + ReLU -> conv3 (1x1) + BN3 stats ----
    y3, st3 = pl.pallas_call(
        _conv3_kernel,
        grid=(num_tiles,),
        in_specs=[row_spec(Cmp), vec_spec(Cmp), vec_spec(Cmp), full_spec(Cmp, Cp)],
        out_specs=[row_spec(Cp), stat_spec(Cp)],
        out_shape=[act_shape(Cp), stat_shape(Cp)],
        compiler_params=cparams,
    )(y2, sc2, sh2, w3p)
    sc3, sh3 = _bn_fold(st3, g3, b3, float(M), eps)

    # ---- stage 4: BN3 + identity shortcut + ReLU ----
    out2d = pl.pallas_call(
        _output_kernel,
        grid=(num_tiles,),
        in_specs=[row_spec(Cp), row_spec(Cp), vec_spec(Cp), vec_spec(Cp)],
        out_specs=row_spec(Cp),
        out_shape=jax.ShapeDtypeStruct((M, Cp), f32),
        compiler_params=cparams,
    )(y3, x2d, sc3, sh3)

    out = out2d[:, :Cout].reshape(N, H, W, Cout)
    return jnp.transpose(out, (0, 3, 1, 2))


def bottleneck_reference(x_nchw, params, eps=1e-5):
    """Pure-JAX reference matching the PyTorch module (training-mode BN)."""
    (w1, g1, b1, w2, g2, b2, w3, g3, b3) = params
    x = jnp.transpose(x_nchw, (0, 2, 3, 1))  # NHWC

    def bn(y, g, b):
        mu = jnp.mean(y, axis=(0, 1, 2), keepdims=True)
        var = jnp.mean((y - mu) ** 2, axis=(0, 1, 2), keepdims=True)
        return (y - mu) * jax.lax.rsqrt(var + eps) * g.reshape(1, 1, 1, -1) \
            + b.reshape(1, 1, 1, -1)

    y = jnp.einsum('nhwc,cd->nhwd', x, w1)
    y = jnp.maximum(bn(y, g1, b1), 0.0)
    y = jax.lax.conv_general_dilated(
        y, w2, window_strides=(1, 1), padding=[(1, 1), (1, 1)],
        dimension_numbers=('NHWC', 'HWIO', 'NHWC'))
    y = jnp.maximum(bn(y, g2, b2), 0.0)
    y = jnp.einsum('nhwc,cd->nhwd', y, w3)
    y = jnp.maximum(bn(y, g3, b3) + x, 0.0)
    return jnp.transpose(y, (0, 3, 1, 2))


if __name__ == "__main__":
    # BottleNeck(in_channels=32, out_channels=8, stride=1, downsample=None)
    N, H, W = 4, 8, 8
    out_channels = 8
    expansion = 4
    Cmid = out_channels
    Cin = out_channels * expansion      # 32 (identity shortcut => Cin == Cout)
    Cout = out_channels * expansion     # 32

    ks = jax.random.split(jax.random.PRNGKey(0), 10)
    x = jax.random.normal(ks[0], (N, Cin, H, W), jnp.float32)

    # conv weights (1x1 as (Cin, Cout); 3x3 as HWIO) -- deterministic init
    w1 = 0.1 * jax.random.normal(ks[1], (Cin, Cmid), jnp.float32)
    w2 = 0.1 * jax.random.normal(ks[2], (3, 3, Cmid, Cmid), jnp.float32)
    w3 = 0.1 * jax.random.normal(ks[3], (Cmid, Cout), jnp.float32)
    # BatchNorm affine params (nontrivial values)
    g1 = 1.0 + 0.1 * jax.random.normal(ks[4], (1, Cmid), jnp.float32)
    b1 = 0.1 * jax.random.normal(ks[5], (1, Cmid), jnp.float32)
    g2 = 1.0 + 0.1 * jax.random.normal(ks[6], (1, Cmid), jnp.float32)
    b2 = 0.1 * jax.random.normal(ks[7], (1, Cmid), jnp.float32)
    g3 = 1.0 + 0.1 * jax.random.normal(ks[8], (1, Cout), jnp.float32)
    b3 = 0.1 * jax.random.normal(ks[9], (1, Cout), jnp.float32)
    params = (w1, g1, b1, w2, g2, b2, w3, g3, b3)

    ref = bottleneck_reference(x, params)
    # tile_imgs=1 forces a >1-tile grid even at this toy size so the tiled
    # pipeline and the cross-tile BN-stat reduction are exercised.
    out = jax.block_until_ready(bottleneck_forward(x, params, tile_imgs=1))

    assert out.shape == (N, Cout, H, W)
    err = jnp.max(jnp.abs(out - ref))
    assert jnp.allclose(out, ref, atol=3e-2, rtol=3e-2), f"max abs diff {err}"
    print("KERNEL_OK")
</pallas_src>

<mosaic_0001>
module attributes {stable_mosaic.version = 11 : i64} {
  func.func @_conv1_kernel(%arg0: i32, %arg1: memref<64x128xbf16, #tpu.memory_space<vmem>>, %arg2: memref<128x128xbf16, #tpu.memory_space<vmem>>, %arg3: memref<64x128xbf16, #tpu.memory_space<vmem>>, %arg4: memref<1x2x128xf32, #tpu.memory_space<vmem>>) attributes {dimension_semantics = [#tpu.dimension_semantics<parallel>], iteration_bounds = array<i64: 4>, scalar_prefetch = 0 : i64, scratch_operands = 0 : i64, tpu.core_type = #tpu.core_type<tc>, window_params = [{transform_indices = @transform_0, window_bounds = array<i64: 64, 128>}, {pipeline_mode = #tpu.pipeline_mode<synchronous>, transform_indices = @transform_1, window_bounds = array<i64: 128, 128>}, {transform_indices = @transform_2, window_bounds = array<i64: 64, 128>}, {transform_indices = @transform_3, window_bounds = array<i64: 1, 2, 128>}]} {
    %c0 = arith.constant 0 : index
    %c0_0 = arith.constant 0 : index
    %0 = vector.load %arg1[%c0, %c0_0] : memref<64x128xbf16, #tpu.memory_space<vmem>>, vector<64x128xbf16>
    %c0_1 = arith.constant 0 : index
    %c0_2 = arith.constant 0 : index
    %1 = vector.load %arg2[%c0_1, %c0_2] : memref<128x128xbf16, #tpu.memory_space<vmem>>, vector<128x128xbf16>
    %cst = arith.constant dense<0.000000e+00> : vector<64x128xf32>
    %2 = tpu.matmul %0, %1, %cst {dimension_numbers = #tpu.dot_dimension_numbers<[1], [0], [0], [1], [0, 0, 1, 1], [], []>} : vector<64x128xbf16>, vector<128x128xbf16>, vector<64x128xf32> -> vector<64x128xf32>
    %3 = arith.truncf %2 : vector<64x128xf32> to vector<64x128xbf16>
    %c0_3 = arith.constant 0 : index
    %c0_4 = arith.constant 0 : index
    %4 = vector.load %arg3[%c0_3, %c0_4] : memref<64x128xbf16, #tpu.memory_space<vmem>>, vector<64x128xbf16>
    tpu.vector_store %arg3[%c0_3, %c0_4], %3 {strides = array<i32>} : memref<64x128xbf16, #tpu.memory_space<vmem>>, vector<64x128xbf16>,
    %cst_5 = arith.constant dense<0.000000e+00> : vector<128xf32>
    %5 = vector.multi_reduction <add>, %2, %cst_5 [0] : vector<64x128xf32> to vector<128xf32>
    %6 = vector.shape_cast %5 : vector<128xf32> to vector<1x128xf32>
    %7 = arith.mulf %2, %2 : vector<64x128xf32>
    %cst_6 = arith.constant dense<0.000000e+00> : vector<128xf32>
    %8 = vector.multi_reduction <add>, %7, %cst_6 [0] : vector<64x128xf32> to vector<128xf32>
    %9 = vector.shape_cast %8 : vector<128xf32> to vector<1x128xf32>
    %10 = tpu.concatenate %6, %9 in 0 : vector<1x128xf32>, vector<1x128xf32> -> vector<2x128xf32>
    %c0_7 = arith.constant 0 : index
    %c0_8 = arith.constant 0 : index
    %c0_9 = arith.constant 0 : index
    %11 = vector.load %arg4[%c0_7, %c0_8, %c0_9] : memref<1x2x128xf32, #tpu.memory_space<vmem>>, vector<1x2x128xf32>
    %12 = vector.shape_cast %11 : vector<1x2x128xf32> to vector<2x128xf32>
    %13 = vector.shape_cast %10 : vector<2x128xf32> to vector<1x2x128xf32>
    tpu.vector_store %arg4[%c0_7, %c0_8, %c0_9], %13 {strides = array<i32>} : memref<1x2x128xf32, #tpu.memory_space<vmem>>, vector<1x2x128xf32>,
    return
  }
  func.func @transform_0(%arg0: i32) -> (i32, i32) {
    %c0_i32 = arith.constant 0 : i32
    %c0_i32_0 = arith.constant 0 : i32
    return %arg0, %c0_i32 : i32, i32
  }
  func.func @transform_1(%arg0: i32) -> (i32, i32) {
    %c0_i32 = arith.constant 0 : i32
    %c0_i32_0 = arith.constant 0 : i32
    %c0_i32_1 = arith.constant 0 : i32
    return %c0_i32, %c0_i32_0 : i32, i32
  }
  func.func @transform_2(%arg0: i32) -> (i32, i32) {
    %c0_i32 = arith.constant 0 : i32
    %c0_i32_0 = arith.constant 0 : i32
    return %arg0, %c0_i32 : i32, i32
  }
  func.func @transform_3(%arg0: i32) -> (i32, i32, i32) {
    %c0_i32 = arith.constant 0 : i32
    %c0_i32_0 = arith.constant 0 : i32
    %c0_i32_1 = arith.constant 0 : i32
    return %arg0, %c0_i32, %c0_i32_0 : i32, i32, i32
  }
}

</mosaic_0001>

<bundles_post_ra>
// kernel: tpu_custom_call.1
= control target key start
LH: loop header
LB: loop body
LE: loop exit
PB: predicated region body
PF: predicated region fallthrough
CT: control target
= control target key end

     0   :  { %9 = vsyncpa [#allocation3], 0  ;;  %s1208_s0 = inlined_call_operand.hbm [shape: bf16[256,128], index: 0, kind: input, shape index: {}]   ;;  %s1209_s1 = inlined_call_operand.hbm [shape: bf16[128,128], index: 1, kind: input, shape index: {}]   ;;  %s1210_s2 = inlined_call_operand.hbm [shape: bf16[256,128], index: 2, kind: output, shape index: {0}]   ;;  %s1211_s3 = inlined_call_operand.hbm [shape: f32[4,2,128], index: 3, kind: output, shape index: {1}]  }
   0x1   :  { %11 = vsyncpa [#allocation3 + $0x1], 0 }
   0x2   :  { %12 = vsyncpa [#allocation6], 0 }
   0x3   :  { %13 = vsyncpa [#allocation4], 0 }
   0x4   :  { %15 = vsyncpa [#allocation4 + $0x1], 0 }
   0x5   :  { %16 = vsyncpa [#allocation9], 0 }
   0x6   :  { %18 = vsyncpa [#allocation9 + $0x1], 0  ;;  %s987_s12 = smov 0   ;;  %s989_s13 = smov 0  }
   0x7   :  { %s991_s14 = smov 0   ;;  %s993_s15 = smov 0  }
   0x8 LB: > { %s1008_s16 = sadd.s32 4294967295, %s957_s15   ;;  %s603_s17 = sadd.s32 4294967294, %s957_s15   ;;  %s957_s15 = sphi %s993_s15, %s1232_s15   ;;  %s953_s14 = sphi %s991_s14, %s1231_s14   ;;  %s949_s13 = sphi %s989_s13, %s1230_s13   ;;  %s945_s12 = sphi %s987_s12, %s1229_s12  }
   0x9   : > { %p44_p0 = scmp.ne.s32.totalorder %s949_s13, %s945_s12  ;;  %p1212_p1 = scmp.eq.s32.totalorder %s1008_s16, 0 }
   0xa   : > { %p95_p3 = scmp.eq.s32.totalorder %s603_s17, 3  ;;  %p604_p5 = scmp.ge.s32.totalorder %s957_s15, 1 }
   0xb   : > { %p1017_p4 = por %p1212_p1, %p44_p0  ;;  %p128_p7 = scmp.lt.s32.totalorder %s957_s15, 5 }
   0xc   : > { %p1022_p6 = por %p95_p3, %p44_p0  ;;  %s959_s21 = smov [#allocation5]  }
   0xd   : > { %s1216_s18 = scalar_select %p1017_p4, 1, 0 }
   0xe   : > { %s1217_s19 = scalar_select %p1022_p6, 1, 0 }
   0xf   : > { %p1027_p8 = pnand %p604_p5, %p128_p7  ;;  %s140_s22 = sshll.u32 %s959_s21, 4  ;;  %s141_s22 = int_to_ptr.vmem [resolvable:$true] %s140_s22 }
  0x10   : > { %s1040_s24 = sadd.s32 1, %s957_s15   ;;  %s31_s25 = sadd.s32 1, %s953_s14 }
  0x11   : > { %s1218_s20 = scalar_select %p1027_p8, 1, 0 }
  0x12   : > { %p737_p9 = pneg %p1027_p8  ;;  %s28_s26 = ssub.s32 %s957_s15, %s1040_s24 }
  0x13   : > { %s816_s27 = scalar_lea.vmem %s141_s22, 1024  ;;  %p824_p3 = scmp.lt.s32.totalorder %s141_s22, %s141_s22 }
  0x14   : > { %p1035_p10 = pnand %p737_p9, %p1212_p1  ;;  %p817_p12 = scmp.ne.s32.totalorder %s141_s22, %s816_s27 }
  0x15   : > { %p825_p5 = scmp.lt.s32.totalorder %s816_s27, %s816_s27 }
  0x16   : > { %p807_p11 = pneg %p1035_p10 }
  0x17   : > { %p826_p7 = por %p825_p5, %p824_p3 }
  0x18   : > { %p819_p13 = pnand %p817_p12, %p807_p11 }
  0x1a   : > { %p820_p0 = pneg %p819_p13 }
  0x1c   : > { %p827_p2 = pnand %p826_p7, %p820_p0 }
  0x1e   : > { %830 = shalt.err (!%p827_p2)
}
  0x1f   : > { %s960_s28 = smov 64   ;;  %s961_s29 = smov 4  }
  0x20   : > { %740 = dma.hbm_to_vmem [thread:$0]  (!%p1035_p10), %s1209_s1, 1024, %s141_s22, [#allocation6], %s960_s28, %s960_s28, %s961_s29  }
  0x21   : > { %p29_p2 = scmp.eq.s32.totalorder %s28_s26, 0  ;;  %p38_p9 = scmp.ne.s32.totalorder %s953_s14, %s949_s13 }
  0x22   : > { %p39_p11 = scmp.eq.s32.totalorder %s957_s15, 0  ;;  %p753_p12 = scmp.lt.s32.totalorder %s957_s15, 4 }
  0x23   : > { %s1060_s5 = scalar_select %p29_p2, %s953_s14, %s31_s25  }
  0x24   : > { %p40_p13 = por %p39_p11, %p38_p9  ;;  %p1220_p0 = scmp.eq.s32.totalorder %s1008_s16, 3 }
  0x25   : > { %s154_s7 = sand.u32 1, %s953_s14   ;;  %s642_s8 = sshll.u32 %s957_s15, 9 }
  0x26   : > { %p1064_p3 = por %p1220_p0, %p38_p9  ;;  %s607_s9 = sshll.u32 %s154_s7, 5 }
  0x27   : > { %s1073_s17 = scalar_lea.hbm %s1208_s0, %s642_s8  ;;  %s158_s21 = scalar_lea.vmem [#allocation2], %s607_s9 }
  0x28   : > { %s1221_s6 = scalar_select %p1064_p3, 1, 0 }
  0x29   : > { %s165_s22 = sshll.u32 %s158_s21, 4  ;;  %p1075_p10 = pnand %p753_p12, %p40_p13  ;;  %s1079_s22 = int_to_ptr.vmem [resolvable:$true] %s165_s22 }
  0x2a   : > { %s1081_s25 = scalar_lea.sflag [#allocation3], %s154_s7  ;;  %s831_s26 = scalar_lea.hbm %s1073_s17, 512 }
  0x2b   : > { %p832_p5 = scmp.ne.s32.totalorder %s1073_s17, %s831_s26  ;;  %p833_p7 = pneg %p1075_p10 }
  0x2c   : > { %s836_s4 = scalar_lea.hbm %s1208_s0, 2048  ;;  %p837_p11 = scmp.lt.s32.totalorder %s1073_s17, %s1208_s0 }
  0x2d   : > { %p834_p2 = pnand %p833_p7, %p832_p5  ;;  %p838_p12 = scmp.lt.s32.totalorder %s836_s4, %s831_s26 }
  0x2f   : > { %p835_p9 = pneg %p834_p2  ;;  %p839_p13 = por %p838_p12, %p837_p11 }
  0x31   : > { %p840_p0 = pnand %p839_p13, %p835_p9 }
  0x33   : > { %843 = shalt.err (!%p840_p0)
}
  0x34   : > { %s844_s7 = scalar_lea.vmem %s1079_s22, 512  ;;  %s962_s10 = smov [#allocation2]  }
  0x35   : > { %p845_p1 = scmp.ne.s32.totalorder %s1079_s22, %s844_s7  ;;  %s849_s11 = sshll.u32 %s962_s10, 4  ;;  %s850_s11 = int_to_ptr.vmem [resolvable:$false] %s849_s11 }
  0x36   : > { %s851_s21 = scalar_lea.vmem %s850_s11, 1024  ;;  %p852_p2 = scmp.lt.s32.totalorder %s1079_s22, %s850_s11 }
  0x37   : > { %p847_p6 = pnand %p845_p1, %p833_p7  ;;  %p853_p3 = scmp.lt.s32.totalorder %s851_s21, %s844_s7 }
  0x39   : > { %p848_p5 = pneg %p847_p6  ;;  %p854_p4 = por %p853_p3, %p852_p2 }
  0x3b   : > { %p855_p8 = pnand %p854_p4, %p848_p5 }
  0x3d   : > { %858 = shalt.err (!%p855_p8)
}
  0x3e   : > { %744 = dma.hbm_to_vmem [thread:$0]  (!%p1075_p10), %s1073_s17, 512, %s1079_s22, %s1081_s25, %s960_s28, %s960_s28, %s961_s29  }
  0x3f   : > { %p1223_p1 = scmp.ne.s32.totalorder %s1218_s20, 0 }
  0x40   : > { %s1108_s26 = sand.u32 (!%p1223_p1), 1, %s949_s13   ;;  %p1224_p4 = scmp.ne.s32.totalorder (!%p1223_p1), %s1216_s18, 0 }
  0x41   : > { %177 = sbr.rel (%p1223_p1) target bundleno = 359 (0x167), region = 28  ;;  %s611_s27 = sshll.u32 (!%p1223_p1), %s1108_s26, 5 }
  0x42   : > { %s180_s30 = scalar_lea.sflag (!%p1223_p1), [#allocation3], %s1108_s26  ;;  %s1114_s23 = scalar_lea.vmem (!%p1223_p1), [#allocation2], %s611_s27 }
  0x46   : > { %928 = dma.done.wait (%p1224_p4), %s180_s30, 512  }
  0x47   : > { %930 = vsyncadd (%p1224_p4), %s180_s30, 4294966784  ;;  %p1225_p6 = scmp.eq.s32.totalorder %s1008_s16, 0 }
  0x49   : > { %932 = dma.done.wait (%p1225_p6), [#allocation6], 1024   ;;  %p1226_p8 = pmov %p1225_p6 }
  0x4a   : > { %v793_v0 = vld [vmem:[#allocation5 + $0x38] sm:$0xff]   ;;  %v794_v1 = vld [vmem:[#allocation5 + $0x30] sm:$0xff]   ;;  %v795_v2 = vld [vmem:[#allocation5 + $0x28] sm:$0xff]   ;;  %s207_s18 = scalar_lea.vmem [#allocation7], %s611_s27  ;;  %s651_s28 = sshll.u32 %s1008_s16, 9 }
  0x4b   : > { %934 = vsyncadd (%p1226_p8), [#allocation6], 4294966272  ;;  %687 = vmatprep.subr.bf16.mxu0 %v793_v0  ;;  %711 = vmatprep.subr.bf16.mxu1 %v793_v0  ;;  %v796_v3 = vld [vmem:[#allocation5 + $0x20] sm:$0xff]   ;;  %v803_v5 = vld [vmem:[%s1114_s23 + $0x10] sm:$0xff]   ;;  %s475_s20 = sshll.u32 %s207_s18, 4  ;;  %s1139_s22 = scalar_lea.hbm %s1210_s2, %s651_s28  ;;  %s1133_s20 = int_to_ptr.vmem [resolvable:$true] %s475_s20 }
  0x4c   : > { %688 = vmatpush3.bf16.msra.mxu0 %v793_v0  ;;  %719 = vmatpush3.bf16.msra.mxu1 %v793_v0  ;;  %v801_v4 = vld [vmem:[%s1114_s23] sm:$0xff]   ;;  %v797_v6 = vld [vmem:[#allocation5 + $0x18] sm:$0xff]   ;;  %v798_v7 = vld [vmem:[#allocation5 + $0x10] sm:$0xff]   ;;  %s457_s25 = scalar_lea.sflag [#allocation4], %s1108_s26  ;;  %s859_s4 = scalar_lea.vmem %s1133_s20, 512 }
  0x4d   : > { %689 = vmatprep.subr.bf16.mxu0 %v794_v1  ;;  %712 = vmatprep.subr.bf16.mxu1 %v794_v1  ;;  %v799_v8 = vld [vmem:[#allocation5 + $0x8] sm:$0xff]   ;;  %v800_v9 = vld [vmem:[#allocation5] sm:$0xff]   ;;  %v804_v11 = vld [vmem:[%s1114_s23 + $0x18] sm:$0xff]   ;;  %p860_p3 = scmp.ne.s32.totalorder %s1133_s20, %s859_s4  ;;  %p1227_p10 = scmp.ne.s32.totalorder %s1221_s6, 0 }
  0x4e   : > { %703 = vmatprep.mubr.bf16.mxu0 %v801_v4  ;;  %707 = vmatprep.mubr.bf16.mxu1 %v803_v5  ;;  %v802_v10 = vld [vmem:[%s1114_s23 + $0x8] sm:$0xff]   ;;  %s963_s8 = smov [#allocation7]  }
  0x4f   : > { %p861_p7 = pnand %p860_p3, %p1227_p10  ;;  %s863_s9 = sshll.u32 %s963_s8, 4  ;;  %s864_s9 = int_to_ptr.vmem [resolvable:$false] %s863_s9 }
  0x50   : > { %690 = vmatpush3.bf16.msra.mxu0 %v794_v1  ;;  %720 = vmatpush3.bf16.msra.mxu1 %v794_v1  ;;  %s865_s7 = scalar_lea.vmem %s864_s9, 1024  ;;  %p866_p11 = scmp.lt.s32.totalorder %s1133_s20, %s864_s9 }
  0x51   : > { %691 = vmatprep.subr.bf16.mxu0 %v795_v2  ;;  %713 = vmatprep.subr.bf16.mxu1 %v795_v2  ;;  %p862_p9 = pneg %p861_p7  ;;  %p867_p12 = scmp.lt.s32.totalorder %s865_s7, %s859_s4 }
  0x53   : > { %p868_p13 = por %p867_p12, %p866_p11 }
  0x54   : > { %692 = vmatpush3.bf16.msra.mxu0 %v795_v2  ;;  %721 = vmatpush3.bf16.msra.mxu1 %v795_v2 }
  0x55   : > { %693 = vmatprep.subr.bf16.mxu0 %v796_v3  ;;  %714 = vmatprep.subr.bf16.mxu1 %v796_v3  ;;  %p869_p0 = pnand %p868_p13, %p862_p9 }
  0x58   : > { %694 = vmatpush3.bf16.msra.mxu0 %v796_v3  ;;  %722 = vmatpush3.bf16.msra.mxu1 %v796_v3 }
  0x59   : > { %695 = vmatprep.subr.bf16.mxu0 %v797_v6  ;;  %715 = vmatprep.subr.bf16.mxu1 %v797_v6 }
  0x5c   : > { %696 = vmatpush3.bf16.msra.mxu0 %v797_v6  ;;  %723 = vmatpush3.bf16.msra.mxu1 %v797_v6 }
  0x5d   : > { %697 = vmatprep.subr.bf16.mxu0 %v798_v7  ;;  %716 = vmatprep.subr.bf16.mxu1 %v798_v7 }
  0x60   : > { %698 = vmatpush3.bf16.msra.mxu0 %v798_v7  ;;  %724 = vmatpush3.bf16.msra.mxu1 %v798_v7 }
  0x61   : > { %699 = vmatprep.subr.bf16.mxu0 %v799_v8  ;;  %717 = vmatprep.subr.bf16.mxu1 %v799_v8 }
  0x64   : > { %700 = vmatpush3.bf16.msra.mxu0 %v799_v8  ;;  %725 = vmatpush3.bf16.msra.mxu1 %v799_v8 }
  0x65   : > { %701 = vmatprep.subr.bf16.mxu0 %v800_v9  ;;  %718 = vmatprep.subr.bf16.mxu1 %v800_v9 }
  0x68   : > { %702 = vmatpush3.bf16.msra.mxu0 %v800_v9  ;;  %726 = vmatpush3.bf16.msra.mxu1 %v800_v9 }
  0x6b   : > { %704 = vmatmul.mubr.bf16.vlgmr.msra.gmra.mxu0 %v802_v10  ;;  %708 = vmatmul.mubr.bf16.vlgmr.msra.gmra.mxu1 %v804_v11 }
 0x12b   : > { %v705_v12 = vpop.f32.mrf.mxu0  ;;  %v1128_v13 = vpop.f32.mrf.mxu1 }
 0x12c   : > { %v434_v27 = vmul.f32 %v705_v12, %v705_v12 }
 0x12d   : > { %v348_v14 = vpop.f32.mrf.mxu0  ;;  %v364_v15 = vpop.f32.mrf.mxu1 }
 0x12e   : > { %v432_v20 = vmul.f32 %v348_v14, %v348_v14 }
 0x12f   : > { %v706_v16 = vpop.f32.mrf.mxu0  ;;  %v710_v17 = vpop.f32.mrf.mxu1 }
 0x130   : > { %v660_v18 = vpack.c.bf16 %v706_v16, %v705_v12  ;;  %v670_v19 = vpack.c.bf16 %v710_v17, %v1128_v13 }
 0x131   : > { %v351_v21 = vpop.f32.mrf.mxu0  ;;  %v367_v22 = vpop.f32.mrf.mxu1 }
 0x132   : > { %672 = vst [vmem:[%s207_s18 + $0x8] sm:$0xff] %v660_v18   ;;  %v655_v23 = vpack.c.bf16 %v351_v21, %v348_v14  ;;  %v419_v24 = vadd.f32 %v351_v21, %v348_v14  ;;  %v433_v25 = vmul.f32 %v351_v21, %v351_v21  ;;  %674 = vst [vmem:[%s207_s18 + $0x18] sm:$0xff] %v670_v19  }
 0x133   : > { %v665_v26 = vpack.c.bf16 %v367_v22, %v364_v15 }
 0x134   : > { %656 = vst [vmem:[%s207_s18] sm:$0xff] %v655_v23   ;;  %v420_v28 = vadd.f32 %v705_v12, %v419_v24  ;;  %v440_v29 = vadd.f32 %v433_v25, %v432_v20 }
 0x135   : > { %673 = vst [vmem:[%s207_s18 + $0x10] sm:$0xff] %v665_v26  }
 0x136   : > { %872 = shalt.err (!%p869_p0)
}
 0x137   : > { %s873_s10 = scalar_lea.hbm %s1139_s22, 512  ;;  %s877_s27 = scalar_lea.hbm %s1210_s2, 2048 }
 0x138   : > { %p874_p5 = scmp.ne.s32.totalorder %s1139_s22, %s873_s10  ;;  %p878_p4 = scmp.lt.s32.totalorder %s1139_s22, %s1210_s2 }
 0x139   : > { %p879_p6 = scmp.lt.s32.totalorder %s877_s27, %s873_s10 }
 0x13a   : > { %p875_p2 = pnand %p874_p5, %p1227_p10 }
 0x13b   : > { %p880_p8 = por %p879_p6, %p878_p4 }
 0x13c   : > { %p876_p1 = pneg %p875_p2 }
 0x13e   : > { %p881_p3 = pnand %p880_p8, %p876_p1 }
 0x140   : > { %884 = shalt.err (!%p881_p3)
}
 0x141   : > { %s964_s18 = smov 64   ;;  %s965_s28 = smov 4   ;;  %v435_v30 = vmul.f32 %v706_v16, %v706_v16  ;;  %v441_v31 = vadd.f32 %v440_v29, %v434_v27  ;;  %v421_v32 = vadd.f32 %v706_v16, %v420_v28  ;;  %v436_v33 = vmul.f32 %v364_v15, %v364_v15 }
 0x142   : > { %733 = dma.vmem_to_hbm [thread:$0]  (%p1227_p10), %s1133_s20, 512, %s1139_s22, %s457_s25, %s964_s18, %s964_s18, %s965_s28   ;;  %v437_v37 = vmul.f32 %v367_v22, %v367_v22  ;;  %v438_v39 = vmul.f32 %v1128_v13, %v1128_v13  ;;  %v439_v42 = vmul.f32 %v710_v17, %v710_v17  ;;  %vm453_vm0 = vcmask 1040384  }
 0x143   : > { %v422_v34 = vadd.f32 %v421_v32, %v364_v15  ;;  %v442_v35 = vadd.f32 %v441_v31, %v435_v30  ;;  %s614_s20 = sshll.u32 %s1108_s26, 1  ;;  %s639_s29 = sshll.u32 %s1008_s16, 5 }
 0x144   : > { %s214_s17 = scalar_lea.vmem [#allocation8], %s614_s20  ;;  %s1172_s8 = scalar_lea.hbm %s1211_s3, %s639_s29 }
 0x145   : > { %v423_v36 = vadd.f32 %v422_v34, %v367_v22  ;;  %v443_v38 = vadd.f32 %v442_v35, %v436_v33  ;;  %s491_s22 = sshll.u32 %s214_s17, 4  ;;  %s462_s9 = scalar_lea.sflag [#allocation9], %s1108_s26  ;;  %s492_s22 = int_to_ptr.vmem [resolvable:$true] %s491_s22 }
 0x146   : > { %s885_s7 = scalar_lea.vmem %s492_s22, 32  ;;  %s966_s16 = smov [#allocation8]  }
 0x147   : > { %v424_v40 = vadd.f32 %v1128_v13, %v423_v36  ;;  %v444_v41 = vadd.f32 %v443_v38, %v437_v37  ;;  %p886_p7 = scmp.ne.s32.totalorder %s492_s22, %s885_s7  ;;  %s889_s10 = sshll.u32 %s966_s16, 4  ;;  %s890_s10 = int_to_ptr.vmem [resolvable:$false] %s889_s10 }
 0x148   : > { %s891_s11 = scalar_lea.vmem %s890_s10, 64  ;;  %p892_p12 = scmp.lt.s32.totalorder %s492_s22, %s890_s10 }
 0x149   : > { %v425_v43 = vadd.f32 %v710_v17, %v424_v40  ;;  %v445_v44 = vadd.f32 %v444_v41, %v438_v39  ;;  %p887_p9 = pnand %p886_p7, %p1227_p10  ;;  %p893_p13 = scmp.lt.s32.totalorder %s891_s11, %s885_s7 }
 0x14b   : > { %v426_v45 = vrot.slane %v425_v43, 4  ;;  %v446_v46 = vadd.f32 %v445_v44, %v439_v42  ;;  %p888_p11 = pneg %p887_p9  ;;  %p894_p0 = por %p893_p13, %p892_p12 }
 0x14d   : > { %v427_v47 = vadd.f32 %v426_v45, %v425_v43  ;;  %v447_v48 = vrot.slane %v446_v46, 4  ;;  %p895_p5 = pnand %p894_p0, %p888_p11 }
 0x14f   : > { %v428_v49 = vrot.slane %v427_v47, 2  ;;  %v448_v50 = vadd.f32 %v447_v48, %v446_v46 }
 0x151   : > { %v429_v51 = vadd.f32 %v428_v49, %v427_v47  ;;  %v449_v52 = vrot.slane %v448_v50, 2 }
 0x153   : > { %v430_v53 = vrot.slane %v429_v51, 1  ;;  %v450_v54 = vadd.f32 %v449_v52, %v448_v50 }
 0x155   : > { %v451_v55 = vrot.slane %v450_v54, 1  ;;  %v431_v56 = vadd.f32 %v430_v53, %v429_v51 }
 0x157   : > { %v452_v57 = vadd.f32 %v451_v55, %v450_v54 }
 0x159   : > { %v454_v58 = vsel %vm453_vm0, %v431_v56, %v452_v57 }
 0x15a   : > { %455 = vst [vmem:[%s214_s17] sm:$0x3] %v454_v58 }
 0x15b   : > { %898 = shalt.err (!%p895_p5)
}
 0x15c   : > { %s899_s21 = scalar_lea.hbm %s1172_s8, 32  ;;  %s903_s30 = scalar_lea.hbm %s1211_s3, 128 }
 0x15d   : > { %p900_p2 = scmp.ne.s32.totalorder %s1172_s8, %s899_s21  ;;  %p904_p6 = scmp.lt.s32.totalorder %s1172_s8, %s1211_s3 }
 0x15e   : > { %p905_p8 = scmp.lt.s32.totalorder %s903_s30, %s899_s21 }
 0x15f   : > { %p901_p1 = pnand %p900_p2, %p1227_p10 }
 0x160   : > { %p906_p3 = por %p905_p8, %p904_p6 }
 0x161   : > { %p902_p4 = pneg %p901_p1 }
 0x163   : > { %p907_p7 = pnand %p906_p3, %p902_p4 }
 0x165   : > { %910 = shalt.err (!%p907_p7)
}
 0x166   : > { %734 = dma.vmem_to_hbm [thread:$0]  (%p1227_p10), %s492_s22, 32, %s1172_s8, %s462_s9  }
 0x167 PF: > { %p755_p9 = scmp.ge.s32.totalorder %s957_s15, 2  ;;  %s503_s28 = sand.u32 1, %s945_s12  }
 0x168   : > { %p1228_p11 = scmp.ne.s32.totalorder %s1217_s19, 0  ;;  %s504_s20 = scalar_lea.sflag [#allocation4], %s503_s28 }
 0x16a   : > { %p746_p12 = pnand %p755_p9, %p1228_p11 }
 0x16c   : > { %p747_p13 = pneg %p746_p12 }
 0x16e   : > { %936 = dma.done.wait (%p747_p13), %s504_s20, 512  }
 0x16f   : > { %938 = vsyncadd (%p747_p13), %s504_s20, 4294966784  ;;  %s513_s29 = scalar_lea.sflag [#allocation9], %s503_s28 }
 0x170   : > { %940 = dma.done.wait (%p747_p13), %s513_s29, 32  }
 0x171   : > { %942 = vsyncadd (%p747_p13), %s513_s29, 4294967264  ;;  %p21_p10 = scmp.ge.s32.totalorder %s1040_s24, 6   ;;  %s1229_s12 = smov %s949_s13 }
 0x172   : > { %s1230_s13 = smov %s953_s14  ;;  %s1231_s14 = smov %s1060_s5 }
 0x173   : > { %s1232_s15 = smov %s1040_s24  ;;  %23 = sbr.rel (!%p21_p10) target bundleno = 8 (0x8), region = 94 }
 0x178   :  { %518 = vsyncpa [#allocation3], 1 }
 0x179   :  { %520 = vsyncpa [#allocation3 + $0x1], 1 }
 0x17a   :  { %521 = vsyncpa [#allocation6], 1 }
 0x17b   :  { %522 = vsyncpa [#allocation4], 1 }
 0x17c   :  { %524 = vsyncpa [#allocation4 + $0x1], 1 }
 0x17d   :  { %525 = vsyncpa [#allocation9], 1 }
 0x17e   :  { %527 = vsyncpa [#allocation9 + $0x1], 1 }

</bundles_post_ra>
